<compile_context>
chip_gen: v7x
topology: tpu7x:2x2x1
jax: 0.10.0
libtpu: 0.0.40
codegen_flags: <defaults>
</compile_context>

<pallas_src>
import functools
import math

import jax
import jax.numpy as jnp
from jax.experimental import pallas as pl
from jax.experimental.pallas import tpu as pltpu

LANE = 128


def _round_up(x, m):
    return ((x + m - 1) // m) * m


def _pad2d(a, rows, cols):
    r, c = a.shape
    return jnp.pad(a, ((0, rows - r), (0, cols - c)))


# --------------------------------------------------------------------------
# Fused multi-layer kernel (small graphs: everything resident in VMEM).
# --------------------------------------------------------------------------
def _sage_fused_kernel(*refs, num_layers, relu_flags, project_first_flags):
    a_ref, dinv_ref, x_ref = refs[0], refs[1], refs[2]
    param_refs = refs[3:3 + 3 * num_layers]
    o_ref = refs[3 + 3 * num_layers]

    a = a_ref[...]            # (Np, Np)  bf16 edge counts (exact small ints)
    dinv = dinv_ref[...]      # (Np, 1)   f32 exact 1/deg
    h = x_ref[...]            # (Np, F0p) bf16
    for l in range(num_layers):
        wl = param_refs[3 * l][...]       # (Fin_p, Fout_p) bf16
        wr = param_refs[3 * l + 1][...]   # (Fin_p, Fout_p) bf16
        b = param_refs[3 * l + 2][...]    # (1, Fout_p)     f32
        if project_first_flags[l]:
            # project then aggregate: dinv * (A @ (X @ W_l))
            proj = jnp.dot(h, wl, preferred_element_type=jnp.float32)
            agg = dinv * jnp.dot(a, proj.astype(jnp.bfloat16),
                                 preferred_element_type=jnp.float32)
        else:
            # aggregate then project: (dinv * (A @ X)) @ W_l
            agg = dinv * jnp.dot(a, h, preferred_element_type=jnp.float32)
            agg = jnp.dot(agg.astype(jnp.bfloat16), wl,
                          preferred_element_type=jnp.float32)
        out = agg + jnp.dot(h, wr, preferred_element_type=jnp.float32) + b
        if relu_flags[l]:
            out = jnp.maximum(out, 0.0)
        if l + 1 < num_layers:
            h = out.astype(jnp.bfloat16)       # stays in VMEM across layers
        else:
            o_ref[...] = out.astype(o_ref.dtype)


def sage_forward_fused(x, a_counts, deg_inv, params, *, vmem_limit_bytes=None):
    """All layers in one pallas_call (A read from HBM exactly once)."""
    n = x.shape[0]
    n_pad = _round_up(n, LANE)                       # lane-dense A blocks
    a_p = _pad2d(a_counts, n_pad, n_pad).astype(jnp.bfloat16)
    d_p = _pad2d(deg_inv, n_pad, 1).astype(jnp.float32)
    f0_pad = _round_up(x.shape[1], LANE)
    x_p = _pad2d(x, n_pad, f0_pad).astype(jnp.bfloat16)

    num_layers = len(params)
    relu_flags, proj_flags = [], []
    flat_args, flat_specs = [], []
    f_in_pad = f0_pad
    max_f = f0_pad
    weight_bytes = 0
    for li, (w_l, w_r, b) in enumerate(params):
        f_out_pad = _round_up(w_l.shape[1], LANE)
        max_f = max(max_f, f_out_pad)
        flat_args += [
            _pad2d(w_l, f_in_pad, f_out_pad).astype(jnp.bfloat16),
            _pad2d(w_r, f_in_pad, f_out_pad).astype(jnp.bfloat16),
            _pad2d(b, 1, f_out_pad).astype(jnp.float32),
        ]
        flat_specs += [
            pl.BlockSpec((f_in_pad, f_out_pad), lambda i: (0, 0)),
            pl.BlockSpec((f_in_pad, f_out_pad), lambda i: (0, 0)),
            pl.BlockSpec((1, f_out_pad), lambda i: (0, 0)),
        ]
        weight_bytes += 2 * f_in_pad * f_out_pad * 2 + f_out_pad * 4
        relu_flags.append(li < num_layers - 1)
        proj_flags.append(f_out_pad <= f_in_pad)
        f_in_pad = f_out_pad
    f_last_pad = f_in_pad
    f_out_last = params[-1][0].shape[1]

    if vmem_limit_bytes is None:
        est = (2 * n_pad * n_pad * 2                 # A (double-buffered)
               + 2 * n_pad * (f0_pad * 2 + 4)        # x + 1/deg
               + 2 * weight_bytes                    # weights + biases
               + 2 * n_pad * f_last_pad * 4          # output
               + 4 * n_pad * max_f * 4)              # in-kernel f32 temporaries
        vmem_limit_bytes = int(min(max(2 * est, 32 << 20), 112 << 20))

    kernel = functools.partial(
        _sage_fused_kernel,
        num_layers=num_layers,
        relu_flags=tuple(relu_flags),
        project_first_flags=tuple(proj_flags),
    )
    out_p = pl.pallas_call(
        kernel,
        out_shape=jax.ShapeDtypeStruct((n_pad, f_last_pad), jnp.float32),
        grid=(1,),
        in_specs=[pl.BlockSpec((n_pad, n_pad), lambda i: (0, 0)),
                  pl.BlockSpec((n_pad, 1), lambda i: (0, 0)),
                  pl.BlockSpec((n_pad, f0_pad), lambda i: (0, 0))] + flat_specs,
        out_specs=pl.BlockSpec((n_pad, f_last_pad), lambda i: (0, 0)),
        compiler_params=pltpu.CompilerParams(vmem_limit_bytes=vmem_limit_bytes),
    )(a_p, d_p, x_p, *flat_args)
    return out_p[:n, :f_out_last]


# --------------------------------------------------------------------------
# Tiled per-layer kernel (large graphs: 2-D grid, f32 VMEM accumulator).
# --------------------------------------------------------------------------
def _project_kernel(x_ref, w_ref, o_ref):
    o_ref[...] = jnp.dot(x_ref[...], w_ref[...],
                         preferred_element_type=jnp.float32).astype(o_ref.dtype)


def _project(x_p, w_p, *, tile_rows, vmem_limit_bytes=None):
    """Row-tiled X @ W in bf16 (used for project-before-aggregate)."""
    n_pad, f_in_pad = x_p.shape
    f_out_pad = w_p.shape[1]
    return pl.pallas_call(
        _project_kernel,
        out_shape=jax.ShapeDtypeStruct((n_pad, f_out_pad), jnp.bfloat16),
        grid=(n_pad // tile_rows,),
        in_specs=[pl.BlockSpec((tile_rows, f_in_pad), lambda i: (i, 0)),
                  pl.BlockSpec((f_in_pad, f_out_pad), lambda i: (0, 0))],
        out_specs=pl.BlockSpec((tile_rows, f_out_pad), lambda i: (i, 0)),
        compiler_params=pltpu.CompilerParams(
            dimension_semantics=("parallel",),
            vmem_limit_bytes=vmem_limit_bytes),
    )(x_p, w_p)


def _sage_layer_tiled_kernel(*refs, apply_relu, apply_wl):
    if apply_wl:
        a_ref, h_ref, xs_ref, dinv_ref, wl_ref, wr_ref, b_ref, o_ref, acc_ref = refs
    else:
        a_ref, h_ref, xs_ref, dinv_ref, wr_ref, b_ref, o_ref, acc_ref = refs
        wl_ref = None

    k = pl.program_id(1)

    @pl.when(k == 0)
    def _():
        acc_ref[...] = jnp.zeros_like(acc_ref)

    # int8 edge counts -> bf16 on the VPU, MXU contraction with f32 accumulate.
    acc_ref[...] += jnp.dot(a_ref[...].astype(jnp.bfloat16), h_ref[...],
                            preferred_element_type=jnp.float32)

    @pl.when(k == pl.num_programs(1) - 1)
    def _():
        agg = acc_ref[...] * dinv_ref[...]      # exact f32 mean (1/deg row scale)
        if apply_wl:
            agg = jnp.dot(agg.astype(jnp.bfloat16), wl_ref[...],
                          preferred_element_type=jnp.float32)
        out = agg + jnp.dot(xs_ref[...], wr_ref[...],
                            preferred_element_type=jnp.float32)
        out = out + b_ref[...]
        if apply_relu:
            out = jnp.maximum(out, 0.0)
        o_ref[...] = out.astype(o_ref.dtype)    # bf16 for non-final layers


def sage_layer_tiled(a_p, x_p, dinv_p, w_l_p, w_r_p, b_p, *, apply_relu,
                     out_dtype, tm, tk, vmem_limit_bytes=None):
    """One SAGE layer, tiled over (row-tiles, reduction-tiles of N)."""
    n_pad = a_p.shape[0]
    f_in_pad = x_p.shape[1]
    f_out_pad = w_l_p.shape[1]

    # Reorder per layer at trace time: project before aggregating if cheaper.
    if f_out_pad < f_in_pad:
        h = _project(x_p, w_l_p, tile_rows=tm)   # (n_pad, f_out_pad) bf16
        apply_wl = False
    else:
        h = x_p
        apply_wl = True
    h_width = h.shape[1]

    if vmem_limit_bytes is None:
        out_isz = jnp.dtype(out_dtype).itemsize
        est = (2 * tm * tk * 1                    # A int8 tile
               + 2 * tk * h_width * 2             # neighbor stream bf16
               + 2 * tm * f_in_pad * 2            # self rows bf16
               + 2 * tm * 4                       # 1/deg
               + 4 * f_in_pad * f_out_pad * 2     # W_l + W_r resident
               + 2 * f_out_pad * 4                # bias
               + 2 * tm * f_out_pad * out_isz     # output tile
               + tm * h_width * 4)                # f32 accumulator scratch
        # Explicit limit: v5e default scoped is only 16 MiB; cap v7x-safe.
        vmem_limit_bytes = int(min(max(2 * est + (8 << 20), 32 << 20), 56 << 20))

    in_specs = [
        pl.BlockSpec((tm, tk), lambda i, k: (i, k)),         # A tile (int8 counts)
        pl.BlockSpec((tk, h_width), lambda i, k: (k, 0)),    # neighbor stream
        pl.BlockSpec((tm, f_in_pad), lambda i, k: (i, 0)),   # self rows (k-resident)
        pl.BlockSpec((tm, 1), lambda i, k: (i, 0)),          # 1/deg   (k-resident)
    ]
    args = [a_p, h, x_p, dinv_p]
    if apply_wl:
        in_specs.append(pl.BlockSpec((f_in_pad, f_out_pad),
                                     lambda i, k: (0, 0)))   # W_l resident
        args.append(w_l_p)
    in_specs += [
        pl.BlockSpec((f_in_pad, f_out_pad), lambda i, k: (0, 0)),   # W_r resident
        pl.BlockSpec((1, f_out_pad), lambda i, k: (0, 0)),          # bias resident
    ]
    args += [w_r_p, b_p]

    kernel = functools.partial(_sage_layer_tiled_kernel,
                               apply_relu=apply_relu, apply_wl=apply_wl)
    return pl.pallas_call(
        kernel,
        out_shape=jax.ShapeDtypeStruct((n_pad, f_out_pad), out_dtype),
        grid=(n_pad // tm, n_pad // tk),
        in_specs=in_specs,
        out_specs=pl.BlockSpec((tm, f_out_pad), lambda i, k: (i, 0)),
        scratch_shapes=[pltpu.VMEM((tm, h_width), jnp.float32)],
        compiler_params=pltpu.CompilerParams(
            dimension_semantics=("parallel", "arbitrary"),
            vmem_limit_bytes=vmem_limit_bytes),
    )(*args)


def sage_forward_tiled(x, a_counts, deg_inv, params, *, tm=512, tk=512,
                       vmem_limit_bytes=None):
    assert tm % LANE == 0 and tk % LANE == 0, "tiles must be multiples of 128"
    n = x.shape[0]
    n128 = _round_up(n, LANE)
    tm = min(tm, n128)
    tk = min(tk, n128)
    n_pad = _round_up(n, math.lcm(tm, tk))

    a_p = _pad2d(a_counts, n_pad, n_pad).astype(jnp.int8)   # 1-byte HBM stream
    dinv_p = _pad2d(deg_inv, n_pad, 1).astype(jnp.float32)
    f_in_pad = _round_up(x.shape[1], LANE)
    h = _pad2d(x, n_pad, f_in_pad).astype(jnp.bfloat16)

    num_layers = len(params)
    out_p = None
    for li, (w_l, w_r, b) in enumerate(params):
        f_out_pad = _round_up(w_l.shape[1], LANE)
        wl_p = _pad2d(w_l, f_in_pad, f_out_pad).astype(jnp.bfloat16)
        wr_p = _pad2d(w_r, f_in_pad, f_out_pad).astype(jnp.bfloat16)
        b_p = _pad2d(b, 1, f_out_pad).astype(jnp.float32)
        last = (li == num_layers - 1)
        out_p = sage_layer_tiled(
            a_p, h, dinv_p, wl_p, wr_p, b_p,
            apply_relu=not last,
            out_dtype=jnp.float32 if last else jnp.bfloat16,
            tm=tm, tk=tk, vmem_limit_bytes=vmem_limit_bytes)
        h = out_p                       # already bf16 for non-final layers
        f_in_pad = f_out_pad
    return out_p[:n, :params[-1][0].shape[1]]


# --------------------------------------------------------------------------
# Glue: adjacency, params, dispatcher, reference.
# --------------------------------------------------------------------------
def build_adjacency(edge_index, num_nodes):
    """Dense edge-count matrix A[dst, src] and exact f32 in-degree inverse."""
    src, dst = edge_index[0], edge_index[1]
    a = jnp.zeros((num_nodes, num_nodes), dtype=jnp.float32)
    a = a.at[dst, src].add(1.0)
    deg_inv = 1.0 / jnp.maximum(jnp.sum(a, axis=1, keepdims=True), 1.0)
    return a, deg_inv


def init_sage_params(key, in_channels, hidden_channels, out_channels, num_layers=2):
    dims = [in_channels] + [hidden_channels] * (num_layers - 1) + [out_channels]
    params = []
    for layer in range(num_layers):
        f_in, f_out = dims[layer], dims[layer + 1]
        key, k1, k2, k3 = jax.random.split(key, 4)
        scale = 1.0 / jnp.sqrt(jnp.float32(f_in))
        w_l = jax.random.uniform(k1, (f_in, f_out), jnp.float32, -scale, scale)
        w_r = jax.random.uniform(k2, (f_in, f_out), jnp.float32, -scale, scale)
        b = jax.random.uniform(k3, (1, f_out), jnp.float32, -scale, scale)
        params.append((w_l, w_r, b))
    return params


def sage_forward(x, edge_index, params, *, fuse_threshold=2048, tm=512, tk=512):
    """Dispatcher: fused A-resident kernel for small N, tiled path otherwise.

    Note (v7x): the fused path runs with grid=(1,) on a single TensorCore;
    lower fuse_threshold there if the tiled path's 2-TC sharding wins.
    """
    n = x.shape[0]
    a_counts, deg_inv = build_adjacency(edge_index, n)
    if n <= fuse_threshold:
        return sage_forward_fused(x, a_counts, deg_inv, params)
    return sage_forward_tiled(x, a_counts, deg_inv, params, tm=tm, tk=tk)


def sage_reference(x, a_counts, deg_inv, params):
    """Plain-JAX f32 reference on bf16-quantized x / weights (exact A, 1/deg)."""
    a_norm = a_counts * deg_inv
    h = x.astype(jnp.bfloat16).astype(jnp.float32)
    num_layers = len(params)
    for li, (w_l, w_r, b) in enumerate(params):
        wl = w_l.astype(jnp.bfloat16).astype(jnp.float32)
        wr = w_r.astype(jnp.bfloat16).astype(jnp.float32)
        out = (a_norm @ h) @ wl + h @ wr + b
        if li < num_layers - 1:
            h = jnp.maximum(out, 0.0).astype(jnp.bfloat16).astype(jnp.float32)
        else:
            h = out
    return h


if __name__ == "__main__":
    key = jax.random.PRNGKey(0)
    k_x, k_e, k_p, k_x2, k_e2, k_p2 = jax.random.split(key, 6)

    # --- small graph -> fused single-kernel path (module's toy scale) ---
    num_nodes, num_edges = 16, 40
    in_c, hid_c, out_c = 8, 32, 16
    x = jax.random.normal(k_x, (num_nodes, in_c), dtype=jnp.float32)
    edge_index = jax.random.randint(k_e, (2, num_edges), 0, num_nodes,
                                    dtype=jnp.int32)
    params = init_sage_params(k_p, in_c, hid_c, out_c, num_layers=2)

    out_fused = jax.block_until_ready(sage_forward(x, edge_index, params))
    assert out_fused.shape == (num_nodes, out_c)
    assert out_fused.dtype == jnp.float32
    a_cnt, dinv = build_adjacency(edge_index, num_nodes)
    ref = sage_reference(x, a_cnt, dinv, params)
    assert jnp.allclose(out_fused, ref, rtol=3e-2, atol=3e-2)

    # --- larger graph -> tiled path: grid (2,2) at tm=tk=512, exercises both
    #     matmul orders (layer1 aggregate-first, layer2 project-first) and the
    #     bf16 intermediate output + int8 adjacency stream.
    num_nodes2, num_edges2 = 1024, 8192
    in_c2, hid_c2, out_c2 = 8, 256, 16
    x2 = jax.random.normal(k_x2, (num_nodes2, in_c2), dtype=jnp.float32)
    edge_index2 = jax.random.randint(k_e2, (2, num_edges2), 0, num_nodes2,
                                     dtype=jnp.int32)
    params2 = init_sage_params(k_p2, in_c2, hid_c2, out_c2, num_layers=2)

    out_tiled = jax.block_until_ready(
        sage_forward(x2, edge_index2, params2, fuse_threshold=0, tm=512, tk=512))
    assert out_tiled.shape == (num_nodes2, out_c2)
    assert out_tiled.dtype == jnp.float32
    a_cnt2, dinv2 = build_adjacency(edge_index2, num_nodes2)
    ref2 = sage_reference(x2, a_cnt2, dinv2, params2)
    assert jnp.allclose(out_tiled, ref2, rtol=3e-2, atol=3e-2)

    print("KERNEL_OK")
</pallas_src>

<mosaic_0001>
module attributes {stable_mosaic.version = 11 : i64} {
  func.func @_sage_fused_kernel(%arg0: i32, %arg1: memref<128x128xbf16, #tpu.memory_space<vmem>>, %arg2: memref<128x1xf32, #tpu.memory_space<vmem>>, %arg3: memref<128x128xbf16, #tpu.memory_space<vmem>>, %arg4: memref<128x128xbf16, #tpu.memory_space<vmem>>, %arg5: memref<128x128xbf16, #tpu.memory_space<vmem>>, %arg6: memref<1x128xf32, #tpu.memory_space<vmem>>, %arg7: memref<128x128xbf16, #tpu.memory_space<vmem>>, %arg8: memref<128x128xbf16, #tpu.memory_space<vmem>>, %arg9: memref<1x128xf32, #tpu.memory_space<vmem>>, %arg10: memref<128x128xf32, #tpu.memory_space<vmem>>) attributes {dimension_semantics = [#tpu.dimension_semantics<arbitrary>], iteration_bounds = array<i64: 1>, scalar_prefetch = 0 : i64, scratch_operands = 0 : i64, tpu.core_type = #tpu.core_type<tc>, window_params = [{pipeline_mode = #tpu.pipeline_mode<synchronous>, transform_indices = @transform_0, window_bounds = array<i64: 128, 128>}, {pipeline_mode = #tpu.pipeline_mode<synchronous>, transform_indices = @transform_1, window_bounds = array<i64: 128, 1>}, {pipeline_mode = #tpu.pipeline_mode<synchronous>, transform_indices = @transform_2, window_bounds = array<i64: 128, 128>}, {pipeline_mode = #tpu.pipeline_mode<synchronous>, transform_indices = @transform_3, window_bounds = array<i64: 128, 128>}, {pipeline_mode = #tpu.pipeline_mode<synchronous>, transform_indices = @transform_4, window_bounds = array<i64: 128, 128>}, {pipeline_mode = #tpu.pipeline_mode<synchronous>, transform_indices = @transform_5, window_bounds = array<i64: 1, 128>}, {pipeline_mode = #tpu.pipeline_mode<synchronous>, transform_indices = @transform_6, window_bounds = array<i64: 128, 128>}, {pipeline_mode = #tpu.pipeline_mode<synchronous>, transform_indices = @transform_7, window_bounds = array<i64: 128, 128>}, {pipeline_mode = #tpu.pipeline_mode<synchronous>, transform_indices = @transform_8, window_bounds = array<i64: 1, 128>}, {pipeline_mode = #tpu.pipeline_mode<synchronous>, transform_indices = @transform_9, window_bounds = array<i64: 128, 128>}]} {
    %c0 = arith.constant 0 : index
    %c0_0 = arith.constant 0 : index
    %0 = vector.load %arg1[%c0, %c0_0] : memref<128x128xbf16, #tpu.memory_space<vmem>>, vector<128x128xbf16>
    %c0_1 = arith.constant 0 : index
    %c0_2 = arith.constant 0 : index
    %1 = vector.load %arg2[%c0_1, %c0_2] : memref<128x1xf32, #tpu.memory_space<vmem>>, vector<128x1xf32>
    %c0_3 = arith.constant 0 : index
    %c0_4 = arith.constant 0 : index
    %2 = vector.load %arg3[%c0_3, %c0_4] : memref<128x128xbf16, #tpu.memory_space<vmem>>, vector<128x128xbf16>
    %c0_5 = arith.constant 0 : index
    %c0_6 = arith.constant 0 : index
    %3 = vector.load %arg4[%c0_5, %c0_6] : memref<128x128xbf16, #tpu.memory_space<vmem>>, vector<128x128xbf16>
    %c0_7 = arith.constant 0 : index
    %c0_8 = arith.constant 0 : index
    %4 = vector.load %arg5[%c0_7, %c0_8] : memref<128x128xbf16, #tpu.memory_space<vmem>>, vector<128x128xbf16>
    %c0_9 = arith.constant 0 : index
    %c0_10 = arith.constant 0 : index
    %5 = vector.load %arg6[%c0_9, %c0_10] : memref<1x128xf32, #tpu.memory_space<vmem>>, vector<1x128xf32>
    %cst = arith.constant dense<0.000000e+00> : vector<128x128xf32>
    %6 = tpu.matmul %2, %3, %cst {dimension_numbers = #tpu.dot_dimension_numbers<[1], [0], [0], [1], [0, 0, 1, 1], [], []>} : vector<128x128xbf16>, vector<128x128xbf16>, vector<128x128xf32> -> vector<128x128xf32>
    %7 = arith.truncf %6 : vector<128x128xf32> to vector<128x128xbf16>
    %cst_11 = arith.constant dense<0.000000e+00> : vector<128x128xf32>
    %8 = tpu.matmul %0, %7, %cst_11 {dimension_numbers = #tpu.dot_dimension_numbers<[1], [0], [0], [1], [0, 0, 1, 1], [], []>} : vector<128x128xbf16>, vector<128x128xbf16>, vector<128x128xf32> -> vector<128x128xf32>
    %9 = vector.broadcast %1 : vector<128x1xf32> to vector<128x128xf32>
    %10 = arith.mulf %9, %8 : vector<128x128xf32>
    %cst_12 = arith.constant dense<0.000000e+00> : vector<128x128xf32>
    %11 = tpu.matmul %2, %4, %cst_12 {dimension_numbers = #tpu.dot_dimension_numbers<[1], [0], [0], [1], [0, 0, 1, 1], [], []>} : vector<128x128xbf16>, vector<128x128xbf16>, vector<128x128xf32> -> vector<128x128xf32>
    %12 = arith.addf %10, %11 : vector<128x128xf32>
    %13 = vector.broadcast %5 : vector<1x128xf32> to vector<128x128xf32>
    %14 = arith.addf %12, %13 : vector<128x128xf32>
    %cst_13 = arith.constant 0.000000e+00 : f32
    %15 = vector.broadcast %cst_13 : f32 to vector<128x128xf32>
    %16 = arith.maximumf %14, %15 : vector<128x128xf32>
    %17 = arith.truncf %16 : vector<128x128xf32> to vector<128x128xbf16>
    %c0_14 = arith.constant 0 : index
    %c0_15 = arith.constant 0 : index
    %18 = vector.load %arg7[%c0_14, %c0_15] : memref<128x128xbf16, #tpu.memory_space<vmem>>, vector<128x128xbf16>
    %c0_16 = arith.constant 0 : index
    %c0_17 = arith.constant 0 : index
    %19 = vector.load %arg8[%c0_16, %c0_17] : memref<128x128xbf16, #tpu.memory_space<vmem>>, vector<128x128xbf16>
    %c0_18 = arith.constant 0 : index
    %c0_19 = arith.constant 0 : index
    %20 = vector.load %arg9[%c0_18, %c0_19] : memref<1x128xf32, #tpu.memory_space<vmem>>, vector<1x128xf32>
    %cst_20 = arith.constant dense<0.000000e+00> : vector<128x128xf32>
    %21 = tpu.matmul %17, %18, %cst_20 {dimension_numbers = #tpu.dot_dimension_numbers<[1], [0], [0], [1], [0, 0, 1, 1], [], []>} : vector<128x128xbf16>, vector<128x128xbf16>, vector<128x128xf32> -> vector<128x128xf32>
    %22 = arith.truncf %21 : vector<128x128xf32> to vector<128x128xbf16>
    %cst_21 = arith.constant dense<0.000000e+00> : vector<128x128xf32>
    %23 = tpu.matmul %0, %22, %cst_21 {dimension_numbers = #tpu.dot_dimension_numbers<[1], [0], [0], [1], [0, 0, 1, 1], [], []>} : vector<128x128xbf16>, vector<128x128xbf16>, vector<128x128xf32> -> vector<128x128xf32>
    %24 = vector.broadcast %1 : vector<128x1xf32> to vector<128x128xf32>
    %25 = arith.mulf %24, %23 : vector<128x128xf32>
    %cst_22 = arith.constant dense<0.000000e+00> : vector<128x128xf32>
    %26 = tpu.matmul %17, %19, %cst_22 {dimension_numbers = #tpu.dot_dimension_numbers<[1], [0], [0], [1], [0, 0, 1, 1], [], []>} : vector<128x128xbf16>, vector<128x128xbf16>, vector<128x128xf32> -> vector<128x128xf32>
    %27 = arith.addf %25, %26 : vector<128x128xf32>
    %28 = vector.broadcast %20 : vector<1x128xf32> to vector<128x128xf32>
    %29 = arith.addf %27, %28 : vector<128x128xf32>
    %c0_23 = arith.constant 0 : index
    %c0_24 = arith.constant 0 : index
    %30 = vector.load %arg10[%c0_23, %c0_24] : memref<128x128xf32, #tpu.memory_space<vmem>>, vector<128x128xf32>
    tpu.vector_store %arg10[%c0_23, %c0_24], %29 {strides = array<i32>} : memref<128x128xf32, #tpu.memory_space<vmem>>, vector<128x128xf32>,
    return
  }
  func.func @transform_0(%arg0: i32) -> (i32, i32) {
    %c0_i32 = arith.constant 0 : i32
    %c0_i32_0 = arith.constant 0 : i32
    %c0_i32_1 = arith.constant 0 : i32
    return %c0_i32, %c0_i32_0 : i32, i32
  }
  func.func @transform_1(%arg0: i32) -> (i32, i32) {
    %c0_i32 = arith.constant 0 : i32
    %c0_i32_0 = arith.constant 0 : i32
    %c0_i32_1 = arith.constant 0 : i32
    return %c0_i32, %c0_i32_0 : i32, i32
  }
  func.func @transform_2(%arg0: i32) -> (i32, i32) {
    %c0_i32 = arith.constant 0 : i32
    %c0_i32_0 = arith.constant 0 : i32
    %c0_i32_1 = arith.constant 0 : i32
    return %c0_i32, %c0_i32_0 : i32, i32
  }
  func.func @transform_3(%arg0: i32) -> (i32, i32) {
    %c0_i32 = arith.constant 0 : i32
    %c0_i32_0 = arith.constant 0 : i32
    %c0_i32_1 = arith.constant 0 : i32
    return %c0_i32, %c0_i32_0 : i32, i32
  }
  func.func @transform_4(%arg0: i32) -> (i32, i32) {
    %c0_i32 = arith.constant 0 : i32
    %c0_i32_0 = arith.constant 0 : i32
    %c0_i32_1 = arith.constant 0 : i32
    return %c0_i32, %c0_i32_0 : i32, i32
  }
  func.func @transform_5(%arg0: i32) -> (i32, i32) {
    %c0_i32 = arith.constant 0 : i32
    %c0_i32_0 = arith.constant 0 : i32
    %c0_i32_1 = arith.constant 0 : i32
    return %c0_i32, %c0_i32_0 : i32, i32
  }
  func.func @transform_6(%arg0: i32) -> (i32, i32) {
    %c0_i32 = arith.constant 0 : i32
    %c0_i32_0 = arith.constant 0 : i32
    %c0_i32_1 = arith.constant 0 : i32
    return %c0_i32, %c0_i32_0 : i32, i32
  }
  func.func @transform_7(%arg0: i32) -> (i32, i32) {
    %c0_i32 = arith.constant 0 : i32
    %c0_i32_0 = arith.constant 0 : i32
    %c0_i32_1 = arith.constant 0 : i32
    return %c0_i32, %c0_i32_0 : i32, i32
  }
  func.func @transform_8(%arg0: i32) -> (i32, i32) {
    %c0_i32 = arith.constant 0 : i32
    %c0_i32_0 = arith.constant 0 : i32
    %c0_i32_1 = arith.constant 0 : i32
    return %c0_i32, %c0_i32_0 : i32, i32
  }
  func.func @transform_9(%arg0: i32) -> (i32, i32) {
    %c0_i32 = arith.constant 0 : i32
    %c0_i32_0 = arith.constant 0 : i32
    %c0_i32_1 = arith.constant 0 : i32
    return %c0_i32, %c0_i32_0 : i32, i32
  }
}

</mosaic_0001>

<bundles_post_ra>
// kernel: tpu_custom_call.1
= control target key start
LH: loop header
LB: loop body
LE: loop exit
PB: predicated region body
PF: predicated region fallthrough
CT: control target
= control target key end

     0   :  { %14 = vsyncpa [#allocation3], 0  ;;  %s2280_s0 = inlined_call_operand.vmem [shape: bf16[128,128], index: 0, kind: input, shape index: {}]   ;;  %s2281_s1 = inlined_call_operand.vmem [shape: f32[128,1], index: 1, kind: input, shape index: {}]   ;;  %s2282_s2 = inlined_call_operand.vmem [shape: bf16[128,128], index: 2, kind: input, shape index: {}]   ;;  %s2283_s3 = inlined_call_operand.hbm [shape: bf16[128,128], index: 3, kind: input, shape index: {}]   ;;  %s2284_s4 = inlined_call_operand.hbm [shape: bf16[128,128], index: 4, kind: input, shape index: {}]   ;;  %s2285_s5 = inlined_call_operand.vmem [shape: f32[1,128], index: 5, kind: input, shape index: {}]   ;;  %s2286_s6 = inlined_call_operand.hbm [shape: bf16[128,128], index: 6, kind: input, shape index: {}]   ;;  %s2287_s7 = inlined_call_operand.hbm [shape: bf16[128,128], index: 7, kind: input, shape index: {}]   ;;  %s2288_s8 = inlined_call_operand.vmem [shape: f32[1,128], index: 8, kind: input, shape index: {}]   ;;  %s2289_s9 = inlined_call_operand.hbm [shape: f32[128,128], index: 9, kind: output, shape index: {}]  }
   0x1   :  { %15 = vsyncpa [#allocation6], 0 }
   0x2   :  { %16 = vsyncpa [#allocation9], 0 }
   0x3   :  { %17 = vsyncpa [#allocation4], 0  ;;  %s1852_s30 = smov [#allocation5]   ;;  %s1853_s11 = smov [#allocation2]  }
   0x4   :  { %s41_s10 = sshll.u32 %s1852_s30, 4  ;;  %s29_s12 = sshll.u32 %s1853_s11, 4  ;;  %s42_s10 = int_to_ptr.vmem [resolvable:$true] %s41_s10  ;;  %s1912_s12 = int_to_ptr.vmem [resolvable:$true] %s29_s12 }
   0x5   :  { %s1734_s15 = scalar_lea.hbm %s2284_s4, 1024 }
   0x6   :  { %p1735_p0 = scmp.ne.s32.totalorder %s2284_s4, %s1734_s15  ;;  %p1738_p1 = scmp.lt.u32.totalorder %s1734_s15, %s2284_s4 }
   0x8   :  { %p1740_p2 = pnand %p1738_p1, %p1735_p0 }
   0xa   :  { %1743 = shalt.err (!%p1740_p2)
}
   0xb   :  { %s1744_s20 = scalar_lea.vmem %s42_s10, 1024  ;;  %p1749_p4 = scmp.lt.s32.totalorder %s42_s10, %s42_s10 }
   0xc   :  { %p1745_p3 = scmp.ne.s32.totalorder %s42_s10, %s1744_s20  ;;  %p1750_p5 = scmp.lt.s32.totalorder %s1744_s20, %s1744_s20 }
   0xe   :  { %p1751_p6 = por %p1750_p5, %p1749_p4 }
  0x10   :  { %p1752_p7 = pnand %p1751_p6, %p1745_p3 }
  0x12   :  { %1755 = shalt.err (!%p1752_p7)
}
  0x13   :  { %s1854_s21 = smov 64   ;;  %s1855_s22 = smov 4  }
  0x14   :  { %47 = dma.hbm_to_vmem [thread:$0]  %s2284_s4, 1024, %s42_s10, [#allocation6], %s1854_s21, %s1854_s21, %s1855_s22  }
  0x15   :  { %s1756_s27 = scalar_lea.hbm %s2283_s3, 1024 }
  0x16   :  { %p1757_p8 = scmp.ne.s32.totalorder %s2283_s3, %s1756_s27  ;;  %p1760_p9 = scmp.lt.u32.totalorder %s1756_s27, %s2283_s3 }
  0x18   :  { %p1762_p10 = pnand %p1760_p9, %p1757_p8 }
  0x1a   :  { %1765 = shalt.err (!%p1762_p10)
}
  0x1b   :  { %s1766_s13 = scalar_lea.vmem %s1912_s12, 1024  ;;  %p1771_p12 = scmp.lt.s32.totalorder %s1912_s12, %s1912_s12 }
  0x1c   :  { %p1767_p11 = scmp.ne.s32.totalorder %s1912_s12, %s1766_s13  ;;  %p1772_p13 = scmp.lt.s32.totalorder %s1766_s13, %s1766_s13 }
  0x1e   :  { %p1773_p0 = por %p1772_p13, %p1771_p12 }
  0x20   :  { %p1774_p1 = pnand %p1773_p0, %p1767_p11 }
  0x22   :  { %1777 = shalt.err (!%p1774_p1)
}
  0x23   :  { %35 = dma.hbm_to_vmem [thread:$0]  %s2283_s3, 1024, %s1912_s12, [#allocation3], %s1854_s21, %s1854_s21, %s1855_s22  }
  0x24   :  { %s1856_s14 = smov [#allocation7]   ;;  %s1857_s16 = smov [#allocation8]  }
  0x25   :  { %s55_s15 = sshll.u32 %s1856_s14, 4  ;;  %s67_s17 = sshll.u32 %s1857_s16, 4  ;;  %s56_s15 = int_to_ptr.vmem [resolvable:$true] %s55_s15  ;;  %s1949_s17 = int_to_ptr.vmem [resolvable:$true] %s67_s17 }
  0x26   :  { %s1778_s20 = scalar_lea.hbm %s2286_s6, 1024 }
  0x27   :  { %p1779_p2 = scmp.ne.s32.totalorder %s2286_s6, %s1778_s20  ;;  %p1782_p3 = scmp.lt.u32.totalorder %s1778_s20, %s2286_s6 }
  0x29   :  { %p1784_p4 = pnand %p1782_p3, %p1779_p2 }
  0x2b   :  { %1787 = shalt.err (!%p1784_p4)
}
  0x2c   :  { %s1788_s3 = scalar_lea.vmem %s56_s15, 1024  ;;  %p1793_p6 = scmp.lt.s32.totalorder %s56_s15, %s56_s15 }
  0x2d   :  { %p1789_p5 = scmp.ne.s32.totalorder %s56_s15, %s1788_s3  ;;  %p1794_p7 = scmp.lt.s32.totalorder %s1788_s3, %s1788_s3 }
  0x2f   :  { %p1795_p8 = por %p1794_p7, %p1793_p6 }
  0x31   :  { %p1796_p9 = pnand %p1795_p8, %p1789_p5 }
  0x33   :  { %1799 = shalt.err (!%p1796_p9)
}
  0x34   :  { %61 = dma.hbm_to_vmem [thread:$0]  %s2286_s6, 1024, %s56_s15, [#allocation6], %s1854_s21, %s1854_s21, %s1855_s22  }
  0x35   :  { %s1800_s30 = scalar_lea.hbm %s2287_s7, 1024 }
  0x36   :  { %p1801_p10 = scmp.ne.s32.totalorder %s2287_s7, %s1800_s30  ;;  %p1804_p11 = scmp.lt.u32.totalorder %s1800_s30, %s2287_s7 }
  0x38   :  { %p1806_p12 = pnand %p1804_p11, %p1801_p10 }
  0x3a   :  { %1809 = shalt.err (!%p1806_p12)
}
  0x3b   :  { %s1810_s14 = scalar_lea.vmem %s1949_s17, 1024  ;;  %p1815_p0 = scmp.lt.s32.totalorder %s1949_s17, %s1949_s17 }
  0x3c   :  { %p1811_p13 = scmp.ne.s32.totalorder %s1949_s17, %s1810_s14  ;;  %p1816_p1 = scmp.lt.s32.totalorder %s1810_s14, %s1810_s14 }
  0x3e   :  { %p1817_p2 = por %p1816_p1, %p1815_p0 }
  0x40   :  { %p1818_p3 = pnand %p1817_p2, %p1811_p13 }
  0x42   :  { %1821 = shalt.err (!%p1818_p3)
}
  0x43   :  { %73 = dma.hbm_to_vmem [thread:$0]  %s2287_s7, 1024, %s1949_s17, [#allocation9], %s1854_s21, %s1854_s21, %s1855_s22  }
  0x44   :  { %1844 = dma.done.wait [#allocation3], 1024  }
  0x45   :  { %1845 = vsyncadd [#allocation3], 4294966272 }
  0x46   :  { %1846 = dma.done.wait [#allocation6], 2048  }
  0x47   :  { %1847 = vsyncadd [#allocation6], 4294965248 }
  0x48   :  { %1848 = dma.done.wait [#allocation9], 1024  }
  0x49   :  { %1849 = vsyncadd [#allocation9], 4294966272  ;;  %v1686_v0 = vld [vmem:[#allocation2] sm:$0xff]   ;;  %v1687_v1 = vld [vmem:[#allocation2 + $0x8] sm:$0xff]   ;;  %v1858_v27 = vmov 0  }
  0x4a   :  { %1482 = vmatprep.subr.bf16.mxu0 %v1686_v0  ;;  %v1688_v2 = vld [vmem:[#allocation2 + $0x10] sm:$0xff]   ;;  %v1689_v3 = vld [vmem:[#allocation2 + $0x18] sm:$0xff]   ;;  %v1694_v4 = vld [vmem:[%s2282_s2] sm:$0xff]   ;;  %1684 = vset.pattern.permute.xlu0 %v1858_v27 }
  0x4b   :  { %1483 = vmatpush3.bf16.msra.mxu0 %v1686_v0  ;;  %1498 = vmatprep.mubr.bf16.mxu0 %v1694_v4  ;;  %v1690_v5 = vld [vmem:[#allocation2 + $0x20] sm:$0xff]   ;;  %v1691_v6 = vld [vmem:[#allocation2 + $0x28] sm:$0xff]   ;;  %v1692_v7 = vld [vmem:[#allocation2 + $0x30] sm:$0xff]  }
  0x4c   :  { %1484 = vmatprep.subr.bf16.mxu0 %v1687_v1  ;;  %v1693_v8 = vld [vmem:[#allocation2 + $0x38] sm:$0xff]   ;;  %v1695_v9 = vld [vmem:[%s2282_s2 + $0x8] sm:$0xff]   ;;  %v1696_v10 = vld [vmem:[%s2282_s2 + $0x10] sm:$0xff]   ;;  %1685 = vset.pattern.permute.xlu1 %v1858_v27 }
  0x4d   :  { %v1697_v11 = vld [vmem:[%s2282_s2 + $0x18] sm:$0xff]   ;;  %v1698_v12 = vld [vmem:[%s2282_s2 + $0x20] sm:$0xff]   ;;  %v1699_v13 = vld [vmem:[%s2282_s2 + $0x28] sm:$0xff]  }
  0x4e   :  { %v1700_v14 = vld [vmem:[%s2282_s2 + $0x30] sm:$0xff]   ;;  %v1701_v15 = vld [vmem:[%s2282_s2 + $0x38] sm:$0xff]   ;;  %v1702_v16 = vld [vmem:[#allocation5] sm:$0xff]  }
  0x4f   :  { %1485 = vmatpush3.bf16.msra.mxu0 %v1687_v1  ;;  %v1703_v17 = vld [vmem:[#allocation5 + $0x8] sm:$0xff]   ;;  %v1704_v18 = vld [vmem:[#allocation5 + $0x10] sm:$0xff]   ;;  %v1705_v19 = vld [vmem:[#allocation5 + $0x18] sm:$0xff]  }
  0x50   :  { %1486 = vmatprep.subr.bf16.mxu0 %v1688_v2  ;;  %v1706_v20 = vld [vmem:[#allocation5 + $0x20] sm:$0xff]   ;;  %v1707_v21 = vld [vmem:[#allocation5 + $0x28] sm:$0xff]   ;;  %v1708_v22 = vld [vmem:[#allocation5 + $0x30] sm:$0xff]  }
  0x51   :  { %v1709_v23 = vld [vmem:[#allocation5 + $0x38] sm:$0xff]   ;;  %v1710_v24 = vld [vmem:[%s2280_s0] sm:$0xff]   ;;  %v107_v26 = vld [vmem:[%s2281_s1 + $0x10] sm:$0xff] }
  0x52   :  { %1530 = vmatprep.mubr.bf16.mxu1 %v1710_v24  ;;  %v105_v25 = vld [vmem:[%s2281_s1] sm:$0xff]  ;;  %528 = vperm.xlu1 %1685, %v107_v26   ;;  %v106_v28 = vld [vmem:[%s2281_s1 + $0x8] sm:$0xff]  ;;  %v108_v29 = vld [vmem:[%s2281_s1 + $0x18] sm:$0xff] }
  0x53   :  { %1487 = vmatpush3.bf16.msra.mxu0 %v1688_v2  ;;  %518 = vperm.xlu0 %1684, %v105_v25   ;;  %v109_v30 = vld [vmem:[%s2281_s1 + $0x20] sm:$0xff]  ;;  %v110_v31 = vld [vmem:[%s2281_s1 + $0x28] sm:$0xff]  ;;  %v111_v32 = vld [vmem:[%s2281_s1 + $0x30] sm:$0xff] }
  0x54   :  { %1488 = vmatprep.subr.bf16.mxu0 %v1689_v3  ;;  %v112_v33 = vld [vmem:[%s2281_s1 + $0x38] sm:$0xff]  ;;  %v113_v34 = vld [vmem:[%s2281_s1 + $0x40] sm:$0xff]  ;;  %v114_v35 = vld [vmem:[%s2281_s1 + $0x48] sm:$0xff] }
  0x55   :  { %v115_v36 = vld [vmem:[%s2281_s1 + $0x50] sm:$0xff]  ;;  %v116_v37 = vld [vmem:[%s2281_s1 + $0x58] sm:$0xff]  ;;  %v117_v38 = vld [vmem:[%s2281_s1 + $0x60] sm:$0xff] }
  0x56   :  { %533 = vperm.xlu1 %1685, %v108_v29   ;;  %v118_v39 = vld [vmem:[%s2281_s1 + $0x68] sm:$0xff]  ;;  %v119_v40 = vld [vmem:[%s2281_s1 + $0x70] sm:$0xff]  ;;  %v120_v41 = vld [vmem:[%s2281_s1 + $0x78] sm:$0xff] }
  0x57   :  { %1489 = vmatpush3.bf16.msra.mxu0 %v1689_v3  ;;  %523 = vperm.xlu0 %1684, %v106_v28   ;;  %v1718_v2 = vld [vmem:[#allocation7] sm:$0xff]   ;;  %v2064_v3 = vld [vmem:[%s2280_s0 + $0x8] sm:$0xff]  }
  0x58   :  { %1490 = vmatprep.subr.bf16.mxu0 %v1690_v5  ;;  %v2103_v25 = vld [vmem:[#allocation8] sm:$0xff]  }
  0x5a   :  { %543 = vperm.xlu1 %1685, %v110_v31  }
  0x5b   :  { %1491 = vmatpush3.bf16.msra.mxu0 %v1690_v5  ;;  %538 = vperm.xlu0 %1684, %v109_v30   ;;  %v1719_v5 = vld [vmem:[#allocation7 + $0x8] sm:$0xff]  }
  0x5c   :  { %1492 = vmatprep.subr.bf16.mxu0 %v1691_v6 }
  0x5e   :  { %553 = vperm.xlu1 %1685, %v112_v33  }
  0x5f   :  { %1493 = vmatpush3.bf16.msra.mxu0 %v1691_v6  ;;  %548 = vperm.xlu0 %1684, %v111_v32   ;;  %v1720_v6 = vld [vmem:[#allocation7 + $0x10] sm:$0xff]  }
  0x60   :  { %1494 = vmatprep.subr.bf16.mxu0 %v1692_v7 }
  0x62   :  { %563 = vperm.xlu1 %1685, %v114_v35  }
  0x63   :  { %1495 = vmatpush3.bf16.msra.mxu0 %v1692_v7  ;;  %558 = vperm.xlu0 %1684, %v113_v34   ;;  %v2076_v7 = vld [vmem:[%s2280_s0 + $0x18] sm:$0xff]  }
  0x64   :  { %1496 = vmatprep.subr.bf16.mxu0 %v1693_v8 }
  0x66   :  { %573 = vperm.xlu1 %1685, %v116_v37  }
  0x67   :  { %1497 = vmatpush3.bf16.msra.mxu0 %v1693_v8  ;;  %568 = vperm.xlu0 %1684, %v115_v36   ;;  %v2081_v8 = vld [vmem:[%s2280_s0 + $0x20] sm:$0xff]  }
  0x68   :  { %1546 = vmatprep.subr.bf16.mxu0 %v1702_v16 }
  0x6a   :  { %1499 = vmatmul.mubr.bf16.vlgmr.msra.gmra.mrb[0].mxu0 %v1695_v9  ;;  %583 = vperm.xlu1 %1685, %v118_v39  }
  0x6b   :  { %1502 = vmatprep.mubr.bf16.mxu0 %v1696_v10  ;;  %1547 = vmatpush3.bf16.msra.mxu0 %v1702_v16 }
  0x6c   :  { %1548 = vmatprep.subr.bf16.mxu0 %v1703_v17  ;;  %578 = vperm.xlu0 %1684, %v117_v38  }
  0x6e   :  { %593 = vperm.xlu1 %1685, %v120_v41  }
  0x6f   :  { %1549 = vmatpush3.bf16.msra.mxu0 %v1703_v17  ;;  %v1723_v17 = vld [vmem:[#allocation7 + $0x28] sm:$0xff]  }
  0x70   :  { %1550 = vmatprep.subr.bf16.mxu0 %v1704_v18  ;;  %588 = vperm.xlu0 %1684, %v119_v40  }
  0x72   :  { %1503 = vmatmul.mubr.bf16.gmra.mrb[4].mxu0 %v1697_v11 }
  0x73   :  { %1506 = vmatprep.mubr.bf16.mxu0 %v1698_v12  ;;  %1551 = vmatpush3.bf16.msra.mxu0 %v1704_v18 }
  0x74   :  { %1552 = vmatprep.subr.bf16.mxu0 %v1705_v19 }
  0x77   :  { %1553 = vmatpush3.bf16.msra.mxu0 %v1705_v19  ;;  %v1724_v19 = vld [vmem:[#allocation7 + $0x30] sm:$0xff]  }
  0x78   :  { %1554 = vmatprep.subr.bf16.mxu0 %v1706_v20 }
  0x7a   :  { %1507 = vmatmul.mubr.bf16.gmra.mrb[8].mxu0 %v1699_v13 }
  0x7b   :  { %1510 = vmatprep.mubr.bf16.mxu0 %v1700_v14  ;;  %1555 = vmatpush3.bf16.msra.mxu0 %v1706_v20 }
  0x7c   :  { %1556 = vmatprep.subr.bf16.mxu0 %v1707_v21 }
  0x7f   :  { %1557 = vmatpush3.bf16.msra.mxu0 %v1707_v21 }
  0x80   :  { %1558 = vmatprep.subr.bf16.mxu0 %v1708_v22 }
  0x82   :  { %1511 = vmatmul.mubr.bf16.gmra.mrb[12].mxu0 %v1701_v15 }
  0x83   :  { %1562 = vmatprep.mubr.bf16.mxu0 %v1694_v4  ;;  %1559 = vmatpush3.bf16.msra.mxu0 %v1708_v22  ;;  %v2069_v4 = vld [vmem:[%s2280_s0 + $0x10] sm:$0xff]  }
  0x84   :  { %1560 = vmatprep.subr.bf16.mxu0 %v1709_v23 }
  0x87   :  { %1561 = vmatpush3.bf16.msra.mxu0 %v1709_v23  ;;  %v1725_v23 = vld [vmem:[#allocation7 + $0x38] sm:$0xff]  }
  0x8a   :  { %1563 = vmatmul.mubr.bf16.vlgmr.msra.gmra.mrb[16].mxu0 %v1695_v9  ;;  %v1721_v9 = vld [vmem:[#allocation7 + $0x18] sm:$0xff]  }
  0x8b   :  { %1566 = vmatprep.mubr.bf16.mxu0 %v1696_v10  ;;  %v1722_v10 = vld [vmem:[#allocation7 + $0x20] sm:$0xff]  }
  0x92   :  { %1567 = vmatmul.mubr.bf16.gmra.mrb[20].mxu0 %v1697_v11  ;;  %v2088_v11 = vld [vmem:[%s2280_s0 + $0x28] sm:$0xff]  }
  0x93   :  { %1570 = vmatprep.mubr.bf16.mxu0 %v1698_v12  ;;  %v2093_v12 = vld [vmem:[%s2280_s0 + $0x30] sm:$0xff]  }
  0x9a   :  { %1571 = vmatmul.mubr.bf16.gmra.mrb[24].mxu0 %v1699_v13  ;;  %v2100_v13 = vld [vmem:[%s2280_s0 + $0x38] sm:$0xff]  }
  0x9b   :  { %1574 = vmatprep.mubr.bf16.mxu0 %v1700_v14 }
  0xa2   :  { %1575 = vmatmul.mubr.bf16.gmra.mrb[28].mxu0 %v1701_v15 }
  0xa3   :  { %1626 = vmatprep.mubr.bf16.mxu0 %v1710_v24 }
  0xd1   :  { %v2124_v35 = vpop.permute.xlu1 %528 }
  0xd2   :  { %v2122_v34 = vpop.permute.xlu0 %518 }
  0xd5   :  { %v2128_v37 = vpop.permute.xlu1 %533 }
  0xd6   :  { %v2126_v36 = vpop.permute.xlu0 %523 }
  0xd9   :  { %v2132_v39 = vpop.permute.xlu1 %543 }
  0xda   :  { %v2130_v38 = vpop.permute.xlu0 %538 }
  0xde   :  { %v2134_v40 = vpop.permute.xlu0 %548 }
 0x13d   :  { %v1500_v42 = vpop.f32.mrb[0].mxu0 }
 0x13e   :  { %v300_v43 = vpop.f32.mrb[1].mxu0 }
 0x13f   :  { %v1501_v44 = vpop.f32.mrb[2].mxu0 }
 0x140   :  { %v364_v45 = vpack.c.bf16 %v1501_v44, %v1500_v42  ;;  %v303_v46 = vpop.f32.mrb[3].mxu0  ;;  %v2137_v44 = vpop.permute.xlu1 %553 }
 0x141   :  { %v363_v47 = vpack.c.bf16 %v303_v46, %v300_v43 }
 0x143   :  { %1514 = vmatprep.subr.bf16.mxu1 %v363_v47 }
 0x144   :  { %1515 = vmatpush3.bf16.msra.mxu1 %v363_v47 }
 0x145   :  { %v1504_v48 = vpop.f32.mrb[4].mxu0  ;;  %1516 = vmatprep.subr.bf16.mxu1 %v364_v45 }
 0x146   :  { %v316_v49 = vpop.f32.mrb[5].mxu0 }
 0x147   :  { %v1505_v50 = vpop.f32.mrb[6].mxu0 }
 0x148   :  { %v366_v51 = vpack.c.bf16 %v1505_v50, %v1504_v48  ;;  %v319_v52 = vpop.f32.mrb[7].mxu0  ;;  %1517 = vmatpush3.bf16.msra.mxu1 %v364_v45  ;;  %v2142_v45 = vld [vmem:[%s2285_s5] ss:$0 sm:$0xff] }
 0x149   :  { %v365_v53 = vpack.c.bf16 %v319_v52, %v316_v49 }
 0x14b   :  { %1518 = vmatprep.subr.bf16.mxu1 %v365_v53 }
 0x14c   :  { %1519 = vmatpush3.bf16.msra.mxu1 %v365_v53 }
 0x14d   :  { %v1508_v54 = vpop.f32.mrb[8].mxu0  ;;  %1520 = vmatprep.subr.bf16.mxu1 %v366_v51 }
 0x14e   :  { %v332_v55 = vpop.f32.mrb[9].mxu0 }
 0x14f   :  { %v1509_v56 = vpop.f32.mrb[10].mxu0 }
 0x150   :  { %v368_v57 = vpack.c.bf16 %v1509_v56, %v1508_v54  ;;  %v335_v58 = vpop.f32.mrb[11].mxu0  ;;  %1521 = vmatpush3.bf16.msra.mxu1 %v366_v51 }
 0x151   :  { %v367_v59 = vpack.c.bf16 %v335_v58, %v332_v55  ;;  %v2148_v55 = vpop.permute.xlu0 %558 }
 0x153   :  { %1522 = vmatprep.subr.bf16.mxu1 %v367_v59 }
 0x154   :  { %1523 = vmatpush3.bf16.msra.mxu1 %v367_v59  ;;  %v2152_v59 = vpop.permute.xlu1 %563 }
 0x155   :  { %v1512_v60 = vpop.f32.mrb[12].mxu0  ;;  %1524 = vmatprep.subr.bf16.mxu1 %v368_v57 }
 0x156   :  { %v348_v61 = vpop.f32.mrb[13].mxu0 }
 0x157   :  { %v1513_v62 = vpop.f32.mrb[14].mxu0 }
 0x158   :  { %v370_v63 = vpack.c.bf16 %v1513_v62, %v1512_v60  ;;  %v351_v0 = vpop.f32.mrb[15].mxu0  ;;  %1525 = vmatpush3.bf16.msra.mxu1 %v368_v57 }
 0x159   :  { %v369_v1 = vpack.c.bf16 %v351_v0, %v348_v61 }
 0x15b   :  { %1526 = vmatprep.subr.bf16.mxu1 %v369_v1 }
 0x15c   :  { %1527 = vmatpush3.bf16.msra.mxu1 %v369_v1 }
 0x15d   :  { %1528 = vmatprep.subr.bf16.mxu1 %v370_v63  ;;  %v1564_v14 = vpop.f32.mrb[16].mxu0 }
 0x15e   :  { %v694_v15 = vpop.f32.mrb[17].mxu0 }
 0x15f   :  { %v1565_v16 = vpop.f32.mrb[18].mxu0 }
 0x160   :  { %1529 = vmatpush3.bf16.msra.mxu1 %v370_v63  ;;  %v697_v18 = vpop.f32.mrb[19].mxu0 }
 0x161   :  { %1578 = vmatprep.subr.bf16.mxu1 %v1718_v2 }
 0x163   :  { %1531 = vmatmul.mubr.bf16.vlgmr.msra.gmra.mrb[0].mxu1 %v2064_v3 }
 0x164   :  { %1534 = vmatprep.mubr.bf16.mxu1 %v2069_v4  ;;  %1579 = vmatpush3.bf16.msra.mxu1 %v1718_v2 }
 0x165   :  { %1580 = vmatprep.subr.bf16.mxu1 %v1719_v5  ;;  %v1568_v20 = vpop.f32.mrb[20].mxu0 }
 0x166   :  { %v710_v21 = vpop.f32.mrb[21].mxu0 }
 0x167   :  { %v1569_v22 = vpop.f32.mrb[22].mxu0 }
 0x168   :  { %1581 = vmatpush3.bf16.msra.mxu1 %v1719_v5  ;;  %v713_v24 = vpop.f32.mrb[23].mxu0 }
 0x169   :  { %1582 = vmatprep.subr.bf16.mxu1 %v1720_v6 }
 0x16b   :  { %1535 = vmatmul.mubr.bf16.gmra.mrb[4].mxu1 %v2076_v7 }
 0x16c   :  { %1538 = vmatprep.mubr.bf16.mxu1 %v2081_v8  ;;  %1583 = vmatpush3.bf16.msra.mxu1 %v1720_v6 }
 0x16d   :  { %1584 = vmatprep.subr.bf16.mxu1 %v1721_v9  ;;  %v2105_v26 = vpop.f32.mrb[24].mxu0 }
 0x16e   :  { %v2108_v27 = vpop.f32.mrb[25].mxu0 }
 0x16f   :  { %v2110_v28 = vpop.f32.mrb[26].mxu0 }
 0x170   :  { %1585 = vmatpush3.bf16.msra.mxu1 %v1721_v9  ;;  %v2112_v29 = vpop.f32.mrb[27].mxu0 }
 0x171   :  { %1586 = vmatprep.subr.bf16.mxu1 %v1722_v10 }
 0x173   :  { %1539 = vmatmul.mubr.bf16.gmra.mrb[8].mxu1 %v2088_v11 }
 0x174   :  { %1542 = vmatprep.mubr.bf16.mxu1 %v2093_v12  ;;  %1587 = vmatpush3.bf16.msra.mxu1 %v1722_v10 }
 0x175   :  { %1588 = vmatprep.subr.bf16.mxu1 %v1723_v17  ;;  %v2114_v30 = vpop.f32.mrb[28].mxu0 }
 0x176   :  { %v2116_v31 = vpop.f32.mrb[29].mxu0 }
 0x177   :  { %v2118_v32 = vpop.f32.mrb[30].mxu0 }
 0x178   :  { %1589 = vmatpush3.bf16.msra.mxu1 %v1723_v17  ;;  %v2120_v33 = vpop.f32.mrb[31].mxu0  ;;  %v2160_v17 = vpop.permute.xlu0 %568 }
 0x179   :  { %1590 = vmatprep.subr.bf16.mxu1 %v1724_v19 }
 0x17b   :  { %1543 = vmatmul.mubr.bf16.gmra.mrb[12].mxu1 %v2100_v13 }
 0x17c   :  { %1591 = vmatpush3.bf16.msra.mxu1 %v1724_v19 }
 0x17d   :  { %1592 = vmatprep.subr.bf16.mxu1 %v1725_v23 }
 0x180   :  { %1593 = vmatpush3.bf16.msra.mxu1 %v1725_v23 }
 0x181   :  { %1642 = vmatprep.subr.bf16.mxu1 %v2103_v25 }
 0x236   :  { %v1532_v41 = vpop.f32.mrb[0].mxu1 }
 0x237   :  { %v598_v42 = vmul.f32 %v1532_v41, %v2124_v35  ;;  %v453_v43 = vpop.f32.mrb[1].mxu1 }
 0x238   :  { %v596_v46 = vmul.f32 %v2122_v34, %v453_v43  ;;  %v1533_v47 = vpop.f32.mrb[2].mxu1  ;;  %v1727_v43 = vld [vmem:[#allocation8 + $0x8] sm:$0xff]  }
 0x239   :  { %v759_v48 = vadd.f32 %v1564_v14, %v598_v42  ;;  %v599_v49 = vmul.f32 %v1533_v47, %v2128_v37  ;;  %v456_v50 = vpop.f32.mrb[3].mxu1 }
 0x23a   :  { %v757_v51 = vadd.f32 %v694_v15, %v596_v46  ;;  %v597_v52 = vmul.f32 %v2126_v36, %v456_v50  ;;  %v2166_v46 = vpop.permute.xlu1 %573 }
 0x23b   :  { %v781_v53 = vadd.f32 %v2142_v45, %v759_v48  ;;  %v760_v54 = vadd.f32 %v1565_v16, %v599_v49 }
 0x23c   :  { %v779_v56 = vadd.f32 %v2142_v45, %v757_v51  ;;  %v758_v57 = vadd.f32 %v697_v18, %v597_v52 }
 0x23d   :  { %v782_v58 = vadd.f32 %v2142_v45, %v760_v54  ;;  %v797_v62 = vmax.f32 %v781_v53, 0.0  ;;  %v1728_v53 = vld [vmem:[#allocation8 + $0x10] sm:$0xff]   ;;  %v2175_v54 = vpop.permute.xlu0 %578 }
 0x23e   :  { %v780_v60 = vadd.f32 %v2142_v45, %v758_v57  ;;  %v1536_v61 = vpop.f32.mrb[4].mxu1  ;;  %v795_v2 = vmax.f32 %v779_v56, 0.0 }
 0x23f   :  { %v798_v63 = vmax.f32 %v782_v58, 0.0  ;;  %v602_v0 = vmul.f32 %v1536_v61, %v2134_v40  ;;  %v469_v1 = vpop.f32.mrb[5].mxu1 }
 0x240   :  { %v796_v5 = vmax.f32 %v780_v60, 0.0  ;;  %v600_v6 = vmul.f32 %v2130_v38, %v469_v1  ;;  %v1537_v9 = vpop.f32.mrb[6].mxu1 }
 0x241   :  { %v2157_v10 = vpack.c.bf16 %v798_v63, %v797_v62  ;;  %v763_v14 = vadd.f32 %v1568_v20, %v602_v0  ;;  %v603_v15 = vmul.f32 %v1537_v9, %v2137_v44  ;;  %v472_v16 = vpop.f32.mrb[7].mxu1  ;;  %v2182_v63 = vpop.permute.xlu1 %583  ;;  %v1729_v9 = vld [vmem:[#allocation8 + $0x18] sm:$0xff]  }
 0x242   :  { %v761_v18 = vadd.f32 %v710_v21, %v600_v6  ;;  %v601_v19 = vmul.f32 %v2132_v39, %v472_v16  ;;  %v2163_v23 = vpack.c.bf16 %v796_v5, %v795_v2 }
 0x243   :  { %v785_v41 = vadd.f32 %v2142_v45, %v763_v14  ;;  %v764_v42 = vadd.f32 %v1569_v22, %v603_v15 }
 0x244   :  { %v783_v47 = vadd.f32 %v2142_v45, %v761_v18  ;;  %v762_v48 = vadd.f32 %v713_v24, %v601_v19  ;;  %1594 = vmatprep.mubr.bf16.mxu1 %v2163_v23 }
 0x245   :  { %v786_v20 = vadd.f32 %v2142_v45, %v764_v42  ;;  %1595 = vmatmul.mubr.bf16.vlgmr.msra.gmra.mrb[16].mxu1 %v2157_v10  ;;  %v801_v50 = vmax.f32 %v785_v41, 0.0 }
 0x246   :  { %v784_v21 = vadd.f32 %v2142_v45, %v762_v48  ;;  %v1540_v49 = vpop.f32.mrb[8].mxu1  ;;  %1643 = vmatpush3.bf16.msra.mxu1 %v2103_v25  ;;  %v799_v24 = vmax.f32 %v783_v47, 0.0  ;;  %v2196_v47 = vpop.permute.xlu1 %593 }
 0x247   :  { %v802_v51 = vmax.f32 %v786_v20, 0.0  ;;  %v606_v22 = vmul.f32 %v1540_v49, %v2160_v17  ;;  %v485_v52 = vpop.f32.mrb[9].mxu1  ;;  %1644 = vmatprep.subr.bf16.mxu1 %v1727_v43 }
 0x248   :  { %v800_v56 = vmax.f32 %v784_v21, 0.0  ;;  %v604_v57 = vmul.f32 %v2148_v55, %v485_v52  ;;  %v1541_v58 = vpop.f32.mrb[10].mxu1 }
 0x249   :  { %v767_v60 = vadd.f32 %v2105_v26, %v606_v22  ;;  %v607_v61 = vmul.f32 %v1541_v58, %v2166_v46  ;;  %v488_v62 = vpop.f32.mrb[11].mxu1  ;;  %v2180_v25 = vpack.c.bf16 %v802_v51, %v801_v50  ;;  %v1731_v58 = vld [vmem:[#allocation8 + $0x28] sm:$0xff]  }
 0x24a   :  { %v765_v0 = vadd.f32 %v2108_v27, %v604_v57  ;;  %v605_v1 = vmul.f32 %v2152_v59, %v488_v62  ;;  %1645 = vmatpush3.bf16.msra.mxu1 %v1727_v43  ;;  %v813_v2 = vpack.c.bf16 %v800_v56, %v799_v24  ;;  %v2192_v27 = vpop.permute.xlu0 %588  ;;  %v1730_v43 = vld [vmem:[#allocation8 + $0x20] sm:$0xff]  }
 0x24b   :  { %v789_v5 = vadd.f32 %v2142_v45, %v767_v60  ;;  %v768_v6 = vadd.f32 %v2110_v28, %v607_v61  ;;  %1646 = vmatprep.subr.bf16.mxu1 %v1728_v53 }
 0x24c   :  { %v787_v26 = vadd.f32 %v2142_v45, %v765_v0  ;;  %v766_v14 = vadd.f32 %v2112_v29, %v605_v1  ;;  %1598 = vmatprep.mubr.bf16.mxu1 %v813_v2  ;;  %v1732_v1 = vld [vmem:[#allocation8 + $0x30] sm:$0xff]  }
 0x24d   :  { %v790_v15 = vadd.f32 %v2142_v45, %v768_v6  ;;  %1599 = vmatmul.mubr.bf16.gmra.mrb[20].mxu1 %v2180_v25  ;;  %v805_v19 = vmax.f32 %v789_v5, 0.0 }
 0x24e   :  { %v788_v16 = vadd.f32 %v2142_v45, %v766_v14  ;;  %v1544_v18 = vpop.f32.mrb[12].mxu1  ;;  %1647 = vmatpush3.bf16.msra.mxu1 %v1728_v53  ;;  %v803_v29 = vmax.f32 %v787_v26, 0.0  ;;  %v1733_v26 = vld [vmem:[#allocation8 + $0x38] sm:$0xff]  }
 0x24f   :  { %v806_v41 = vmax.f32 %v790_v15, 0.0  ;;  %v610_v28 = vmul.f32 %v1544_v18, %v2192_v27  ;;  %v501_v42 = vpop.f32.mrb[13].mxu1  ;;  %1648 = vmatprep.subr.bf16.mxu1 %v1729_v9 }
 0x250   :  { %v804_v48 = vmax.f32 %v788_v16, 0.0  ;;  %v608_v20 = vmul.f32 %v2175_v54, %v501_v42  ;;  %v1545_v21 = vpop.f32.mrb[14].mxu1 }
 0x251   :  { %v771_v49 = vadd.f32 %v2114_v30, %v610_v28  ;;  %v611_v50 = vmul.f32 %v1545_v21, %v2196_v47  ;;  %v504_v51 = vpop.f32.mrb[15].mxu1  ;;  %v816_v22 = vpack.c.bf16 %v806_v41, %v805_v19 }
 0x252   :  { %v769_v52 = vadd.f32 %v2116_v31, %v608_v20  ;;  %v609_v53 = vmul.f32 %v2182_v63, %v504_v51  ;;  %1649 = vmatpush3.bf16.msra.mxu1 %v1729_v9  ;;  %v815_v24 = vpack.c.bf16 %v804_v48, %v803_v29 }
 0x253   :  { %v793_v56 = vadd.f32 %v2142_v45, %v771_v49  ;;  %v772_v57 = vadd.f32 %v2118_v32, %v611_v50  ;;  %1650 = vmatprep.subr.bf16.mxu1 %v1730_v43 }
 0x254   :  { %v791_v60 = vadd.f32 %v2142_v45, %v769_v52  ;;  %v770_v30 = vadd.f32 %v2120_v33, %v609_v53  ;;  %1602 = vmatprep.mubr.bf16.mxu1 %v815_v24 }
 0x255   :  { %v794_v61 = vadd.f32 %v2142_v45, %v772_v57  ;;  %1603 = vmatmul.mubr.bf16.gmra.mrb[24].mxu1 %v816_v22  ;;  %v809_v62 = vmax.f32 %v793_v56, 0.0 }
 0x256   :  { %v792_v31 = vadd.f32 %v2142_v45, %v770_v30  ;;  %1651 = vmatpush3.bf16.msra.mxu1 %v1730_v43  ;;  %v807_v5 = vmax.f32 %v791_v60, 0.0 }
 0x257   :  { %v810_v0 = vmax.f32 %v794_v61, 0.0  ;;  %1652 = vmatprep.subr.bf16.mxu1 %v1731_v58 }
 0x258   :  { %v808_v6 = vmax.f32 %v792_v31, 0.0 }
 0x259   :  { %v818_v32 = vpack.c.bf16 %v810_v0, %v809_v62 }
 0x25a   :  { %1653 = vmatpush3.bf16.msra.mxu1 %v1731_v58  ;;  %v817_v9 = vpack.c.bf16 %v808_v6, %v807_v5 }
 0x25b   :  { %1654 = vmatprep.subr.bf16.mxu1 %v1732_v1 }
 0x25c   :  { %1606 = vmatprep.mubr.bf16.mxu1 %v817_v9 }
 0x25d   :  { %1607 = vmatmul.mubr.bf16.gmra.mrb[28].mxu1 %v818_v32 }
 0x25e   :  { %1655 = vmatpush3.bf16.msra.mxu1 %v1732_v1  ;;  %1658 = vmatprep.mubr.bf16.mxu1 %v2163_v23 }
 0x25f   :  { %1656 = vmatprep.subr.bf16.mxu1 %v1733_v26 }
 0x262   :  { %1657 = vmatpush3.bf16.msra.mxu1 %v1733_v26 }
 0x265   :  { %1659 = vmatmul.mubr.bf16.vlgmr.msra.gmra.mrb[32].mxu1 %v2157_v10 }
 0x266   :  { %1662 = vmatprep.mubr.bf16.mxu1 %v813_v2 }
 0x26d   :  { %1663 = vmatmul.mubr.bf16.gmra.mrb[36].mxu1 %v2180_v25 }
 0x26e   :  { %1666 = vmatprep.mubr.bf16.mxu1 %v815_v24 }
 0x275   :  { %1667 = vmatmul.mubr.bf16.gmra.mrb[40].mxu1 %v816_v22 }
 0x276   :  { %1670 = vmatprep.mubr.bf16.mxu1 %v817_v9 }
 0x27d   :  { %1671 = vmatmul.mubr.bf16.gmra.mrb[44].mxu1 %v818_v32 }
 0x318   :  { %v1596_v33 = vpop.f32.mrb[16].mxu1 }
 0x319   :  { %v934_v45 = vpop.f32.mrb[17].mxu1 }
 0x31a   :  { %v1597_v14 = vpop.f32.mrb[18].mxu1 }
 0x31b   :  { %v998_v15 = vpack.c.bf16 %v1597_v14, %v1596_v33  ;;  %v937_v16 = vpop.f32.mrb[19].mxu1 }
 0x31c   :  { %v997_v18 = vpack.c.bf16 %v937_v16, %v934_v45 }
 0x31e   :  { %1610 = vmatprep.subr.bf16.mxu0 %v997_v18 }
 0x31f   :  { %1611 = vmatpush3.bf16.msra.mxu0 %v997_v18 }
 0x320   :  { %v1600_v23 = vpop.f32.mrb[20].mxu1  ;;  %1612 = vmatprep.subr.bf16.mxu0 %v998_v15 }
 0x321   :  { %v950_v19 = vpop.f32.mrb[21].mxu1 }
 0x322   :  { %v1601_v41 = vpop.f32.mrb[22].mxu1 }
 0x323   :  { %v1000_v10 = vpack.c.bf16 %v1601_v41, %v1600_v23  ;;  %v953_v2 = vpop.f32.mrb[23].mxu1  ;;  %1613 = vmatpush3.bf16.msra.mxu0 %v998_v15 }
 0x324   :  { %v999_v25 = vpack.c.bf16 %v953_v2, %v950_v19 }
 0x326   :  { %1614 = vmatprep.subr.bf16.mxu0 %v999_v25 }
 0x327   :  { %1615 = vmatpush3.bf16.msra.mxu0 %v999_v25 }
 0x328   :  { %v1604_v28 = vpop.f32.mrb[24].mxu1  ;;  %1616 = vmatprep.subr.bf16.mxu0 %v1000_v10 }
 0x329   :  { %v966_v42 = vpop.f32.mrb[25].mxu1 }
 0x32a   :  { %v1605_v43 = vpop.f32.mrb[26].mxu1 }
 0x32b   :  { %v1002_v29 = vpack.c.bf16 %v1605_v43, %v1604_v28  ;;  %v969_v48 = vpop.f32.mrb[27].mxu1  ;;  %1617 = vmatpush3.bf16.msra.mxu0 %v1000_v10 }
 0x32c   :  { %v1001_v20 = vpack.c.bf16 %v969_v48, %v966_v42 }
 0x32e   :  { %1618 = vmatprep.subr.bf16.mxu0 %v1001_v20 }
 0x32f   :  { %1619 = vmatpush3.bf16.msra.mxu0 %v1001_v20 }
 0x330   :  { %v1608_v21 = vpop.f32.mrb[28].mxu1  ;;  %1620 = vmatprep.subr.bf16.mxu0 %v1002_v29 }
 0x331   :  { %v982_v49 = vpop.f32.mrb[29].mxu1 }
 0x332   :  { %v1609_v50 = vpop.f32.mrb[30].mxu1 }
 0x333   :  { %v1004_v51 = vpack.c.bf16 %v1609_v50, %v1608_v21  ;;  %v985_v22 = vpop.f32.mrb[31].mxu1  ;;  %1621 = vmatpush3.bf16.msra.mxu0 %v1002_v29 }
 0x334   :  { %v1003_v52 = vpack.c.bf16 %v985_v22, %v982_v49 }
 0x336   :  { %1622 = vmatprep.subr.bf16.mxu0 %v1003_v52 }
 0x337   :  { %1623 = vmatpush3.bf16.msra.mxu0 %v1003_v52 }
 0x338   :  { %1624 = vmatprep.subr.bf16.mxu0 %v1004_v51  ;;  %v1660_v53 = vpop.f32.mrb[32].mxu1 }
 0x339   :  { %v1200_v24 = vpop.f32.mrb[33].mxu1 }
 0x33a   :  { %v1661_v56 = vpop.f32.mrb[34].mxu1 }
 0x33b   :  { %1625 = vmatpush3.bf16.msra.mxu0 %v1004_v51  ;;  %v1203_v57 = vpop.f32.mrb[35].mxu1 }
 0x33e   :  { %1627 = vmatmul.mubr.bf16.vlgmr.msra.gmra.mrb[32].mxu0 %v2064_v3 }
 0x33f   :  { %1630 = vmatprep.mubr.bf16.mxu0 %v2069_v4 }
 0x340   :  { %v1664_v58 = vpop.f32.mrb[36].mxu1 }
 0x341   :  { %v1216_v60 = vpop.f32.mrb[37].mxu1 }
 0x342   :  { %v1665_v30 = vpop.f32.mrb[38].mxu1 }
 0x343   :  { %v1219_v61 = vpop.f32.mrb[39].mxu1 }
 0x346   :  { %1631 = vmatmul.mubr.bf16.gmra.mrb[36].mxu0 %v2076_v7 }
 0x347   :  { %1634 = vmatprep.mubr.bf16.mxu0 %v2081_v8 }
 0x348   :  { %v1668_v31 = vpop.f32.mrb[40].mxu1 }
 0x349   :  { %v1232_v62 = vpop.f32.mrb[41].mxu1 }
 0x34a   :  { %v1669_v0 = vpop.f32.mrb[42].mxu1 }
 0x34b   :  { %v1235_v1 = vpop.f32.mrb[43].mxu1 }
 0x34e   :  { %1635 = vmatmul.mubr.bf16.gmra.mrb[40].mxu0 %v2088_v11  ;;  %v2231_v11 = vld [vmem:[%s2288_s8] ss:$0 sm:$0xff]  ;;  %s1859_s8 = smov [#allocation10]  }
 0x34f   :  { %1638 = vmatprep.mubr.bf16.mxu0 %v2093_v12  ;;  %s1322_s12 = sshll.u32 %s1859_s8, 4  ;;  %s1323_s12 = int_to_ptr.vmem [resolvable:$true] %s1322_s12 }
 0x350   :  { %v2218_v5 = vpop.f32.mrb[44].mxu1  ;;  %s1822_s27 = scalar_lea.vmem %s1323_s12, 2048  ;;  %p1827_p5 = scmp.lt.s32.totalorder %s1323_s12, %s1323_s12 }
 0x351   :  { %v2220_v3 = vpop.f32.mrb[45].mxu1  ;;  %p1823_p4 = scmp.ne.s32.totalorder %s1323_s12, %s1822_s27  ;;  %p1828_p6 = scmp.lt.s32.totalorder %s1822_s27, %s1822_s27 }
 0x352   :  { %v2222_v4 = vpop.f32.mrb[46].mxu1 }
 0x353   :  { %v2224_v6 = vpop.f32.mrb[47].mxu1  ;;  %p1829_p7 = por %p1828_p6, %p1827_p5 }
 0x355   :  { %p1830_p8 = pnand %p1829_p7, %p1823_p4 }
 0x356   :  { %1639 = vmatmul.mubr.bf16.gmra.mrb[44].mxu0 %v2100_v13 }
 0x411   :  { %v1628_v7 = vpop.f32.mrb[32].mxu0 }
 0x412   :  { %v1104_v8 = vmul.f32 %v1628_v7, %v2124_v35  ;;  %v1039_v32 = vpop.f32.mrb[33].mxu0 }
 0x413   :  { %v1102_v12 = vmul.f32 %v1039_v32, %v2122_v34  ;;  %v1629_v9 = vpop.f32.mrb[34].mxu0 }
 0x414   :  { %v1265_v26 = vadd.f32 %v1660_v53, %v1104_v8  ;;  %v1105_v33 = vmul.f32 %v1629_v9, %v2128_v37  ;;  %v1042_v45 = vpop.f32.mrb[35].mxu0 }
 0x415   :  { %v1263_v14 = vadd.f32 %v1200_v24, %v1102_v12  ;;  %v1103_v15 = vmul.f32 %v1042_v45, %v2126_v36 }
 0x416   :  { %v1287_v13 = vadd.f32 %v2231_v11, %v1265_v26  ;;  %v1266_v16 = vadd.f32 %v1661_v56, %v1105_v33 }
 0x417   :  { %v1285_v35 = vadd.f32 %v2231_v11, %v1263_v14  ;;  %v1264_v18 = vadd.f32 %v1203_v57, %v1103_v15 }
 0x418   :  { %1303 = vst [vmem:[#allocation10 + $0x10] sm:$0xff] %v1287_v13  ;;  %v1288_v23 = vadd.f32 %v2231_v11, %v1266_v16 }
 0x419   :  { %1301 = vst [vmem:[#allocation10] sm:$0xff] %v1285_v35  ;;  %v1286_v34 = vadd.f32 %v2231_v11, %v1264_v18  ;;  %v1632_v19 = vpop.f32.mrb[36].mxu0 }
 0x41a   :  { %1304 = vst [vmem:[#allocation10 + $0x18] sm:$0xff] %v1288_v23  ;;  %v1108_v37 = vmul.f32 %v1632_v19, %v2134_v40  ;;  %v1055_v41 = vpop.f32.mrb[37].mxu0 }
 0x41b   :  { %1302 = vst [vmem:[#allocation10 + $0x8] sm:$0xff] %v1286_v34  ;;  %v1106_v36 = vmul.f32 %v1055_v41, %v2130_v38  ;;  %v1633_v10 = vpop.f32.mrb[38].mxu0 }
 0x41c   :  { %v1269_v2 = vadd.f32 %v1664_v58, %v1108_v37  ;;  %v1109_v25 = vmul.f32 %v1633_v10, %v2137_v44  ;;  %v1058_v28 = vpop.f32.mrb[39].mxu0 }
 0x41d   :  { %v1267_v42 = vadd.f32 %v1216_v60, %v1106_v36  ;;  %v1107_v43 = vmul.f32 %v1058_v28, %v2132_v39 }
 0x41e   :  { %v1291_v29 = vadd.f32 %v2231_v11, %v1269_v2  ;;  %v1270_v48 = vadd.f32 %v1665_v30, %v1109_v25 }
 0x41f   :  { %v1289_v20 = vadd.f32 %v2231_v11, %v1267_v42  ;;  %v1268_v21 = vadd.f32 %v1219_v61, %v1107_v43 }
 0x420   :  { %1307 = vst [vmem:[#allocation10 + $0x30] sm:$0xff] %v1291_v29  ;;  %v1292_v40 = vadd.f32 %v2231_v11, %v1270_v48 }
 0x421   :  { %1305 = vst [vmem:[#allocation10 + $0x20] sm:$0xff] %v1289_v20  ;;  %v1290_v38 = vadd.f32 %v2231_v11, %v1268_v21  ;;  %v1636_v49 = vpop.f32.mrb[40].mxu0 }
 0x422   :  { %1308 = vst [vmem:[#allocation10 + $0x38] sm:$0xff] %v1292_v40  ;;  %v1112_v44 = vmul.f32 %v1636_v49, %v2160_v17  ;;  %v1071_v50 = vpop.f32.mrb[41].mxu0 }
 0x423   :  { %1306 = vst [vmem:[#allocation10 + $0x28] sm:$0xff] %v1290_v38  ;;  %v1110_v39 = vmul.f32 %v1071_v50, %v2148_v55  ;;  %v1637_v51 = vpop.f32.mrb[42].mxu0 }
 0x424   :  { %v1273_v22 = vadd.f32 %v1668_v31, %v1112_v44  ;;  %v1113_v52 = vmul.f32 %v1637_v51, %v2166_v46  ;;  %v1074_v53 = vpop.f32.mrb[43].mxu0 }
 0x425   :  { %v1271_v24 = vadd.f32 %v1232_v62, %v1110_v39  ;;  %v1111_v56 = vmul.f32 %v1074_v53, %v2152_v59 }
 0x426   :  { %v1295_v57 = vadd.f32 %v2231_v11, %v1273_v22  ;;  %v1274_v58 = vadd.f32 %v1669_v0, %v1113_v52 }
 0x427   :  { %v1293_v60 = vadd.f32 %v2231_v11, %v1271_v24  ;;  %v1272_v30 = vadd.f32 %v1235_v1, %v1111_v56 }
 0x428   :  { %1311 = vst [vmem:[#allocation10 + $0x50] sm:$0xff] %v1295_v57  ;;  %v1296_v17 = vadd.f32 %v2231_v11, %v1274_v58 }
 0x429   :  { %1309 = vst [vmem:[#allocation10 + $0x40] sm:$0xff] %v1293_v60  ;;  %v1294_v55 = vadd.f32 %v2231_v11, %v1272_v30  ;;  %v1640_v61 = vpop.f32.mrb[44].mxu0 }
 0x42a   :  { %1312 = vst [vmem:[#allocation10 + $0x58] sm:$0xff] %v1296_v17  ;;  %v1116_v46 = vmul.f32 %v1640_v61, %v2192_v27  ;;  %v1087_v31 = vpop.f32.mrb[45].mxu0 }
 0x42b   :  { %1310 = vst [vmem:[#allocation10 + $0x48] sm:$0xff] %v1294_v55  ;;  %v1114_v59 = vmul.f32 %v1087_v31, %v2175_v54  ;;  %v1641_v62 = vpop.f32.mrb[46].mxu0 }
 0x42c   :  { %v1277_v0 = vadd.f32 %v2218_v5, %v1116_v46  ;;  %v1117_v7 = vmul.f32 %v1641_v62, %v2196_v47  ;;  %v1090_v1 = vpop.f32.mrb[47].mxu0 }
 0x42d   :  { %v1275_v8 = vadd.f32 %v2220_v3, %v1114_v59  ;;  %v1115_v32 = vmul.f32 %v1090_v1, %v2182_v63 }
 0x42e   :  { %v1299_v12 = vadd.f32 %v2231_v11, %v1277_v0  ;;  %v1278_v27 = vadd.f32 %v2222_v4, %v1117_v7 }
 0x42f   :  { %v1297_v9 = vadd.f32 %v2231_v11, %v1275_v8  ;;  %v1276_v54 = vadd.f32 %v2224_v6, %v1115_v32 }
 0x430   :  { %1315 = vst [vmem:[#allocation10 + $0x70] sm:$0xff] %v1299_v12  ;;  %v1300_v5 = vadd.f32 %v2231_v11, %v1278_v27 }
 0x431   :  { %1313 = vst [vmem:[#allocation10 + $0x60] sm:$0xff] %v1297_v9  ;;  %v1298_v47 = vadd.f32 %v2231_v11, %v1276_v54 }
 0x432   :  { %1316 = vst [vmem:[#allocation10 + $0x78] sm:$0xff] %v1300_v5 }
 0x433   :  { %1314 = vst [vmem:[#allocation10 + $0x68] sm:$0xff] %v1298_v47 }
 0x434   :  { %1833 = shalt.err (!%p1830_p8)
}
 0x435   :  { %s1834_s29 = scalar_lea.hbm %s2289_s9, 2048 }
 0x436   :  { %p1835_p9 = scmp.ne.s32.totalorder %s2289_s9, %s1834_s29  ;;  %p1838_p10 = scmp.lt.u32.totalorder %s1834_s29, %s2289_s9 }
 0x438   :  { %p1840_p11 = pnand %p1838_p10, %p1835_p9 }
 0x43a   :  { %1843 = shalt.err (!%p1840_p11)
}
 0x43b   :  { %s1860_s10 = smov 128   ;;  %s1861_s14 = smov 8  }
 0x43c   :  { %1328 = dma.vmem_to_hbm [thread:$0]  %s1323_s12, 2048, %s2289_s9, [#allocation4], %s1860_s10, %s1860_s10, %s1861_s14  }
 0x43d   :  { %1850 = dma.done.wait [#allocation4], 2048  }
 0x43e   :  { %1851 = vsyncadd [#allocation4], 4294965248 }
 0x43f   :  { %1332 = vsyncpa [#allocation3], 1 }
 0x440   :  { %1333 = vsyncpa [#allocation6], 1 }
 0x441   :  { %1334 = vsyncpa [#allocation9], 1 }
 0x442   :  { %1335 = vsyncpa [#allocation4], 1 }

</bundles_post_ra>
